<compile_context>
chip_gen: v7x
topology: tpu7x:2x2x1
jax: 0.10.0
libtpu: 0.0.40
codegen_flags: <defaults>
</compile_context>

<pallas_src>
import jax
import jax.numpy as jnp
from jax.experimental import pallas as pl
from jax.experimental.pallas import tpu as pltpu


def _round_up(x, m):
    return -(-x // m) * m


def _pick_tile(dim, max_tile, multiple):
    """Largest tile <= max_tile that is a multiple of `multiple` and divides
    `dim`; falls back to the full dim (always a legal BlockSpec size)."""
    if dim <= max_tile:
        return dim
    t = (max_tile // multiple) * multiple
    while t >= multiple:
        if dim % t == 0:
            return t
        t -= multiple
    return dim


# --------------------------------------------------------------------------
# Kernels
# --------------------------------------------------------------------------
def _linear_relu_acc_kernel(x_ref, w_ref, b_ref, o_ref, acc_ref):
    """Multi-K-step path: f32 VMEM accumulator across the K grid axis.

    x_ref: (tm, tk) compute_dtype   w_ref: (tk, tn) compute_dtype (pre-transposed)
    b_ref: (1, tn)  f32             o_ref: (tm, tn) f32   acc_ref: (tm, tn) f32
    """
    k = pl.program_id(2)

    @pl.when(k == 0)
    def _():
        acc_ref[...] = jnp.zeros_like(acc_ref)

    acc_ref[...] += jnp.dot(x_ref[...], w_ref[...],
                            preferred_element_type=jnp.float32)

    @pl.when(k == pl.num_programs(2) - 1)
    def _():
        y = acc_ref[...] + b_ref[...]          # bias broadcast over rows
        o_ref[...] = jnp.maximum(y, 0.0).astype(o_ref.dtype)


def _linear_relu_kernel(x_ref, w_ref, b_ref, o_ref):
    """Single-K-step path: no scratch accumulator round trips."""
    y = jnp.dot(x_ref[...], w_ref[...],
                preferred_element_type=jnp.float32) + b_ref[...]
    o_ref[...] = jnp.maximum(y, 0.0).astype(o_ref.dtype)


# --------------------------------------------------------------------------
# Wrapper
# --------------------------------------------------------------------------
def hidden_layer(x, weight, bias, *, compute_dtype=jnp.bfloat16,
                 tm_max=None, tn_max=None, tk_max=1024):
    """ReLU(x @ weight.T + bias), matching torch.nn.Linear + ReLU.

    x:      (M, K)  float32
    weight: (N, K)  float32   (PyTorch nn.Linear convention)
    bias:   (N,)    float32
    Returns (M, N) float32.
    """
    M, K = x.shape
    N, K2 = weight.shape
    assert K == K2 and bias.shape == (N,)

    # ---- per-generation VMEM / tile budget --------------------------------
    try:
        vmem_cap = int(pltpu.get_tpu_info().vmem_capacity_bytes)
    except Exception:
        vmem_cap = 64 * 1024 * 1024           # conservative (v7x per-TC)
    vmem_headroom = int(0.75 * vmem_cap)      # leave 25% for the compiler
    big_vmem = vmem_cap >= 100 * 1024 * 1024  # v5e / v6e (128 MiB)
    if tm_max is None:
        tm_max = 1024 if big_vmem else 512
    if tn_max is None:
        tn_max = 1024 if big_vmem else 512

    itemsize = jnp.dtype(compute_dtype).itemsize
    sub_mult = max(8, 32 // itemsize)         # 16 for bf16, 8 for f32

    # ---- M tiling: pad waste capped at one sub-tile ------------------------
    if M <= tm_max:
        tm = _round_up(M, sub_mult)
        M_pad = tm
    else:
        M_pad = _round_up(M, 128)
        tm = _pick_tile(M_pad, tm_max, 128)

    # ---- N tiling: lane-dense (128-multiple) output, 256-aligned if possible
    N_pad = _round_up(N, 128)
    n_align = 256 if N_pad % 256 == 0 else 128
    tn = _pick_tile(N_pad, tn_max, n_align)

    # ---- K tiling -----------------------------------------------------------
    if K % 128 == 0 or K > tk_max:
        K_pad = _round_up(K, 128)
        k_align = 256 if K_pad % 256 == 0 else 128
        tk = _pick_tile(K_pad, tk_max, k_align)
    else:
        K_pad = K                              # small K: one full-dim tile
        tk = K_pad

    # ---- guarantee >= 2 parallel blocks so both v7x TensorCores get work ---
    if (M_pad // tm) * (N_pad // tn) == 1:
        if tm % (2 * sub_mult) == 0:
            tm //= 2
        elif tn >= 256:
            tn //= 2

    grid_m, grid_n, grid_k = M_pad // tm, N_pad // tn, K_pad // tk

    # ---- pad / cast operands -----------------------------------------------
    xc = x.astype(compute_dtype)
    if M_pad != M or K_pad != K:
        xc = jnp.pad(xc, ((0, M_pad - M), (0, K_pad - K)))
    # One-time (K, N) transposed, narrow-dtype weight: transpose-free MXU feed
    # and half the weight DMA bytes.
    wt = weight.T.astype(compute_dtype)
    if K_pad != K or N_pad != N:
        wt = jnp.pad(wt, ((0, K_pad - K), (0, N_pad - N)))
    b2 = bias.astype(jnp.float32)
    if N_pad != N:
        b2 = jnp.pad(b2, (0, N_pad - N))
    b2 = b2.reshape(1, N_pad)

    # ---- VMEM budget + cost hint -------------------------------------------
    buf_bytes = (2 * (tm * tk + tk * tn) * itemsize   # double-buffered x / W
                 + 2 * (tm * tn + tn) * 4             # double-buffered out / bias
                 + tm * tn * 4)                       # f32 accumulator
    vmem_limit = int(min(vmem_headroom, max(2 * buf_bytes, 32 * 1024 * 1024)))

    cost = pl.CostEstimate(
        flops=2 * M_pad * K_pad * N_pad,
        transcendentals=0,
        bytes_accessed=(itemsize * (M_pad * K_pad + K_pad * N_pad)
                        + 4 * (M_pad * N_pad + N_pad)))

    out_shape = jax.ShapeDtypeStruct((M_pad, N_pad), jnp.float32)

    if grid_k == 1:
        # Single K step: skip accumulator init / += / epilogue re-read.
        grid_spec = pltpu.PrefetchScalarGridSpec(
            num_scalar_prefetch=0,
            grid=(grid_m, grid_n),
            in_specs=[
                pl.BlockSpec((tm, tk), lambda i, j: (i, 0)),    # x tile
                pl.BlockSpec((tk, tn), lambda i, j: (0, j)),    # W^T tile (K,N)
                pl.BlockSpec((1, tn), lambda i, j: (0, j)),     # bias tile
            ],
            out_specs=pl.BlockSpec((tm, tn), lambda i, j: (i, j)),
        )
        kernel = _linear_relu_kernel
        dim_sem = ("parallel", "parallel")
    else:
        grid_spec = pltpu.PrefetchScalarGridSpec(
            num_scalar_prefetch=0,
            grid=(grid_m, grid_n, grid_k),
            in_specs=[
                pl.BlockSpec((tm, tk), lambda i, j, k: (i, k)),  # x tile
                pl.BlockSpec((tk, tn), lambda i, j, k: (k, j)),  # W^T tile (K,N)
                pl.BlockSpec((1, tn), lambda i, j, k: (0, j)),   # bias tile
            ],
            out_specs=pl.BlockSpec((tm, tn), lambda i, j, k: (i, j)),
            scratch_shapes=[pltpu.VMEM((tm, tn), jnp.float32)],
        )
        kernel = _linear_relu_acc_kernel
        dim_sem = ("parallel", "parallel", "arbitrary")

    out = pl.pallas_call(
        kernel,
        out_shape=out_shape,
        grid_spec=grid_spec,
        compiler_params=pltpu.CompilerParams(
            dimension_semantics=dim_sem,
            vmem_limit_bytes=vmem_limit),
        cost_estimate=cost,
    )(xc, wt, b2)

    if M_pad != M or N_pad != N:
        out = out[:M, :N]
    return out


# --------------------------------------------------------------------------
# Self-test
# --------------------------------------------------------------------------
def _f32_reference(x, weight, bias):
    return jnp.maximum(x @ weight.T + bias, 0.0)


def _bf16_reference(x, weight, bias):
    # Same bf16-rounded operands as the kernel, accumulated in f32.
    xc = x.astype(jnp.bfloat16).astype(jnp.float32)
    wc = weight.astype(jnp.bfloat16).astype(jnp.float32)
    return jnp.maximum(xc @ wc.T + bias, 0.0)


if __name__ == "__main__":
    key = jax.random.PRNGKey(0)

    # Case 1: small shapes consistent with the module (batch=8, in=32, out=32).
    M, K, N = 8, 32, 32
    kx, kw, kb, key = jax.random.split(key, 4)
    bound = 1.0 / (K ** 0.5)
    x = jax.random.normal(kx, (M, K), dtype=jnp.float32)
    w = jax.random.uniform(kw, (N, K), minval=-bound, maxval=bound,
                           dtype=jnp.float32)
    b = jax.random.uniform(kb, (N,), minval=-bound, maxval=bound,
                           dtype=jnp.float32)
    out = jax.block_until_ready(hidden_layer(x, w, b))
    assert out.shape == (M, N)
    assert jnp.allclose(out, _bf16_reference(x, w, b), atol=2e-3, rtol=2e-3)
    assert jnp.allclose(out, _f32_reference(x, w, b), atol=5e-2, rtol=5e-2)

    # Case 2: exercises M/N/K tiling, the K accumulator and padding paths.
    M2, K2, N2 = 200, 2048, 256
    kx, kw, kb, key = jax.random.split(key, 4)
    bound2 = 1.0 / (K2 ** 0.5)
    x2 = jax.random.normal(kx, (M2, K2), dtype=jnp.float32)
    w2 = jax.random.uniform(kw, (N2, K2), minval=-bound2, maxval=bound2,
                            dtype=jnp.float32)
    b2 = jax.random.uniform(kb, (N2,), minval=-bound2, maxval=bound2,
                            dtype=jnp.float32)
    out2 = jax.block_until_ready(hidden_layer(x2, w2, b2))
    assert out2.shape == (M2, N2)
    assert jnp.allclose(out2, _bf16_reference(x2, w2, b2), atol=2e-3, rtol=2e-3)
    assert jnp.allclose(out2, _f32_reference(x2, w2, b2), atol=5e-2, rtol=5e-2)

    print("KERNEL_OK")
</pallas_src>

<mosaic_0001>
module attributes {stable_mosaic.version = 11 : i64} {
  func.func @_linear_relu_kernel(%arg0: i32, %arg1: i32, %arg2: memref<16x32xbf16, #tpu.memory_space<vmem>>, %arg3: memref<32x128xbf16, #tpu.memory_space<vmem>>, %arg4: memref<1x128xf32, #tpu.memory_space<vmem>>, %arg5: memref<16x128xf32, #tpu.memory_space<vmem>>) attributes {dimension_semantics = [#tpu.dimension_semantics<parallel>, #tpu.dimension_semantics<parallel>], iteration_bounds = array<i64: 1, 1>, scalar_prefetch = 0 : i64, scratch_operands = 0 : i64, tpu.core_type = #tpu.core_type<tc>, window_params = [{transform_indices = @transform_0, window_bounds = array<i64: 16, 32>}, {transform_indices = @transform_1, window_bounds = array<i64: 32, 128>}, {transform_indices = @transform_2, window_bounds = array<i64: 1, 128>}, {transform_indices = @transform_3, window_bounds = array<i64: 16, 128>}]} {
    %c0 = arith.constant 0 : index
    %c0_0 = arith.constant 0 : index
    %0 = vector.load %arg2[%c0, %c0_0] : memref<16x32xbf16, #tpu.memory_space<vmem>>, vector<16x32xbf16>
    %c0_1 = arith.constant 0 : index
    %c0_2 = arith.constant 0 : index
    %1 = vector.load %arg3[%c0_1, %c0_2] : memref<32x128xbf16, #tpu.memory_space<vmem>>, vector<32x128xbf16>
    %cst = arith.constant dense<0.000000e+00> : vector<16x128xf32>
    %2 = tpu.matmul %0, %1, %cst {dimension_numbers = #tpu.dot_dimension_numbers<[1], [0], [0], [1], [0, 0, 1, 1], [], []>} : vector<16x32xbf16>, vector<32x128xbf16>, vector<16x128xf32> -> vector<16x128xf32>
    %c0_3 = arith.constant 0 : index
    %c0_4 = arith.constant 0 : index
    %3 = vector.load %arg4[%c0_3, %c0_4] : memref<1x128xf32, #tpu.memory_space<vmem>>, vector<1x128xf32>
    %4 = vector.broadcast %3 : vector<1x128xf32> to vector<16x128xf32>
    %5 = arith.addf %2, %4 : vector<16x128xf32>
    %cst_5 = arith.constant 0.000000e+00 : f32
    %6 = vector.broadcast %cst_5 : f32 to vector<16x128xf32>
    %7 = arith.maximumf %5, %6 : vector<16x128xf32>
    %c0_6 = arith.constant 0 : index
    %c0_7 = arith.constant 0 : index
    %8 = vector.load %arg5[%c0_6, %c0_7] : memref<16x128xf32, #tpu.memory_space<vmem>>, vector<16x128xf32>
    tpu.vector_store %arg5[%c0_6, %c0_7], %7 {strides = array<i32>} : memref<16x128xf32, #tpu.memory_space<vmem>>, vector<16x128xf32>,
    return
  }
  func.func @transform_0(%arg0: i32, %arg1: i32) -> (i32, i32) {
    %c0_i32 = arith.constant 0 : i32
    %c0_i32_0 = arith.constant 0 : i32
    return %arg0, %c0_i32 : i32, i32
  }
  func.func @transform_1(%arg0: i32, %arg1: i32) -> (i32, i32) {
    %c0_i32 = arith.constant 0 : i32
    %c0_i32_0 = arith.constant 0 : i32
    return %c0_i32, %arg1 : i32, i32
  }
  func.func @transform_2(%arg0: i32, %arg1: i32) -> (i32, i32) {
    %c0_i32 = arith.constant 0 : i32
    %c0_i32_0 = arith.constant 0 : i32
    return %c0_i32, %arg1 : i32, i32
  }
  func.func @transform_3(%arg0: i32, %arg1: i32) -> (i32, i32) {
    %c0_i32 = arith.constant 0 : i32
    return %arg0, %arg1 : i32, i32
  }
}

</mosaic_0001>

<bundles_post_ra>
// kernel: tpu_custom_call.1
= control target key start
LH: loop header
LB: loop body
LE: loop exit
PB: predicated region body
PF: predicated region fallthrough
CT: control target
= control target key end

     0   :  { %8 = vsyncpa [#allocation3], 0  ;;  %s309_s0 = inlined_call_operand.hbm [shape: bf16[16,32], index: 0, kind: input, shape index: {}]   ;;  %s310_s1 = inlined_call_operand.hbm [shape: bf16[32,128], index: 1, kind: input, shape index: {}]   ;;  %s311_s2 = inlined_call_operand.vmem [shape: f32[1,128], index: 2, kind: input, shape index: {}]   ;;  %s312_s3 = inlined_call_operand.hbm [shape: f32[16,128], index: 3, kind: output, shape index: {}]  }
   0x1   :  { %9 = vsyncpa [#allocation6], 0 }
   0x2   :  { %10 = vsyncpa [#allocation4], 0  ;;  %s241_s12 = smov [#allocation2]   ;;  %s169_s16 = scalar_lea.hbm %s309_s0, 128 }
   0x3   :  { %s16_s13 = sshll.u32 %s241_s12, 4  ;;  %p170_p0 = scmp.ne.s32.totalorder %s309_s0, %s169_s16  ;;  %s17_s13 = int_to_ptr.vmem [resolvable:$true] %s16_s13 }
   0x4   :  { %p173_p1 = scmp.lt.u32.totalorder %s169_s16, %s309_s0 }
   0x6   :  { %p175_p2 = pnand %p173_p1, %p170_p0 }
   0x8   :  { %178 = shalt.err (!%p175_p2)
}
   0x9   :  { %s179_s21 = scalar_lea.vmem %s17_s13, 128  ;;  %p184_p4 = scmp.lt.s32.totalorder %s17_s13, %s17_s13 }
   0xa   :  { %p180_p3 = scmp.ne.s32.totalorder %s17_s13, %s179_s21  ;;  %p185_p5 = scmp.lt.s32.totalorder %s179_s21, %s179_s21 }
   0xc   :  { %p186_p6 = por %p185_p5, %p184_p4 }
   0xe   :  { %p187_p7 = pnand %p186_p6, %p180_p3 }
  0x10   :  { %190 = shalt.err (!%p187_p7)
}
  0x11   :  { %s242_s22 = smov 64   ;;  %s243_s23 = smov 4  }
  0x12   :  { %22 = dma.hbm_to_vmem [thread:$0]  %s309_s0, 128, %s17_s13, [#allocation3], %s242_s22, %s242_s22, %s243_s23  }
  0x13   :  { %s244_s26 = smov [#allocation5]   ;;  %s191_s30 = scalar_lea.hbm %s310_s1, 256 }
  0x14   :  { %s28_s27 = sshll.u32 %s244_s26, 4  ;;  %p192_p8 = scmp.ne.s32.totalorder %s310_s1, %s191_s30  ;;  %s29_s27 = int_to_ptr.vmem [resolvable:$true] %s28_s27 }
  0x15   :  { %p195_p9 = scmp.lt.u32.totalorder %s191_s30, %s310_s1 }
  0x17   :  { %p197_p10 = pnand %p195_p9, %p192_p8 }
  0x19   :  { %200 = shalt.err (!%p197_p10)
}
  0x1a   :  { %s201_s8 = scalar_lea.vmem %s29_s27, 256  ;;  %p206_p12 = scmp.lt.s32.totalorder %s29_s27, %s29_s27 }
  0x1b   :  { %p202_p11 = scmp.ne.s32.totalorder %s29_s27, %s201_s8  ;;  %p207_p13 = scmp.lt.s32.totalorder %s201_s8, %s201_s8 }
  0x1d   :  { %p208_p0 = por %p207_p13, %p206_p12 }
  0x1f   :  { %p209_p1 = pnand %p208_p0, %p202_p11 }
  0x21   :  { %212 = shalt.err (!%p209_p1)
}
  0x22   :  { %34 = dma.hbm_to_vmem [thread:$0]  %s310_s1, 256, %s29_s27, [#allocation6], %s242_s22, %s242_s22, %s243_s23  }
  0x23   :  { %235 = dma.done.wait [#allocation3], 128  }
  0x24   :  { %236 = vsyncadd [#allocation3], 4294967168 }
  0x25   :  { %237 = dma.done.wait [#allocation6], 256  }
  0x26   :  { %238 = vsyncadd [#allocation6], 4294967040  ;;  %v245_v0 = vmov 0.0   ;;  %vm246_vm0 = vmmov 0   ;;  %v166_v1 = vld [vmem:[#allocation5] sm:$0xff]   ;;  %v167_v2 = vld [vmem:[#allocation5 + $0x8] sm:$0xff]  }
  0x27   :  { %149 = vmatprep.subr.bf16.mxu0 %v245_v0  ;;  %153 = vmatprep.mubr.msk.bf16.mxu0 %vm246_vm0, %v245_v0  ;;  %v168_v3 = vld [vmem:[#allocation2] sm:$0xff]   ;;  %vm74_vm1 = vcmask 261120   ;;  %s247_s1 = smov [#allocation7]  }
  0x28   :  { %150 = vmatpush3.bf16.msra.mxu0 %v166_v1  ;;  %v141_v4 = vld [vmem:[%s311_s2] ss:$0 sm:$0xff]  ;;  %s128_s12 = sshll.u32 %s247_s1, 4  ;;  %s129_s12 = int_to_ptr.vmem [resolvable:$true] %s128_s12 }
  0x29   :  { %151 = vmatprep.subr.bf16.mxu0 %v245_v0  ;;  %s213_s13 = scalar_lea.vmem %s129_s12, 256  ;;  %p218_p3 = scmp.lt.s32.totalorder %s129_s12, %s129_s12 }
  0x2a   :  { %p214_p2 = scmp.ne.s32.totalorder %s129_s12, %s213_s13  ;;  %p219_p4 = scmp.lt.s32.totalorder %s213_s13, %s213_s13 }
  0x2c   :  { %152 = vmatpush3.bf16.msra.mxu0 %v167_v2  ;;  %p220_p5 = por %p219_p4, %p218_p3 }
  0x2e   :  { %p221_p6 = pnand %p220_p5, %p214_p2 }
  0x2f   :  { %154 = vmatmul.mubr.msk.bf16.vlgmr.msra.gmra.mrb[0].mxu0 %vm74_vm1, %v168_v3 }
 0x102   :  { %v112_v5 = vpop.f32.mrb[0].mxu0 }
 0x103   :  { %v113_v6 = vadd.f32 %v141_v4, %v112_v5  ;;  %v155_v7 = vpop.f32.mrb[1].mxu0 }
 0x104   :  { %v115_v8 = vpop.f32.mrb[2].mxu0 }
 0x105   :  { %v119_v9 = vmax.f32 %v113_v6, 0.0  ;;  %v116_v10 = vadd.f32 %v141_v4, %v115_v8  ;;  %v156_v11 = vpop.f32.mrb[3].mxu0 }
 0x107   :  { %121 = vst [vmem:[#allocation7] sm:$0xff] %v119_v9  ;;  %v120_v12 = vmax.f32 %v116_v10, 0.0 }
 0x109   :  { %122 = vst [vmem:[#allocation7 + $0x8] sm:$0xff] %v120_v12 }
 0x10a   :  { %224 = shalt.err (!%p221_p6)
}
 0x10b   :  { %s225_s15 = scalar_lea.hbm %s312_s3, 256 }
 0x10c   :  { %p226_p7 = scmp.ne.s32.totalorder %s312_s3, %s225_s15  ;;  %p229_p8 = scmp.lt.u32.totalorder %s225_s15, %s312_s3 }
 0x10e   :  { %p231_p9 = pnand %p229_p8, %p226_p7 }
 0x110   :  { %234 = shalt.err (!%p231_p9)
}
 0x111   :  { %s248_s20 = smov 128   ;;  %s249_s21 = smov 8  }
 0x112   :  { %134 = dma.vmem_to_hbm [thread:$0]  %s129_s12, 256, %s312_s3, [#allocation4], %s248_s20, %s248_s20, %s249_s21  }
 0x113   :  { %239 = dma.done.wait [#allocation4], 256  }
 0x114   :  { %240 = vsyncadd [#allocation4], 4294967040 }
 0x115   :  { %138 = vsyncpa [#allocation3], 1 }
 0x116   :  { %139 = vsyncpa [#allocation6], 1 }
 0x117   :  { %140 = vsyncpa [#allocation4], 1 }

</bundles_post_ra>
